<compile_context>
chip_gen: v7x
topology: tpu7x:2x2x1
jax: 0.10.0
libtpu: 0.0.40
codegen_flags: <defaults>
</compile_context>

<pallas_src>
import functools

import jax
import jax.numpy as jnp
from jax.experimental import pallas as pl
from jax.experimental.pallas import tpu as pltpu

_LOG_CLAMP = -100.0                      # PyTorch BCELoss clamps log terms at -100
_LANE = 128
_TARGET_TILE_BYTES = 4 * 1024 * 1024     # per input, per pipeline buffer


def _round_up(x: int, m: int) -> int:
    return (x + m - 1) // m * m


def _cdiv(a: int, b: int) -> int:
    return (a + b - 1) // b


def _bce_kernel(pred_ref, tgt_ref, out_ref, acc_ref, *,
                neg_inv_len, minor_size, minor_block,
                k_per_split, k_total, n_splits, binary_targets):
    """Accumulates (negative) per-sample BCE partial sums.

    Block shapes:
      3-D path: pred/tgt blocks (tn, tr, 128), acc (tn, 128)
      2-D path: pred/tgt blocks (tn, tl),      acc (tn, 1)
    Grid: (batch_blocks, n_splits, k_per_split); axis 2 is the reduction.
    """
    k = pl.program_id(2)
    # Global reduction-block index (splits cover contiguous chunks of blocks).
    g = pl.program_id(1) * k_per_split + k

    @pl.when(k == 0)
    def _():
        acc_ref[...] = jnp.zeros_like(acc_ref)

    # Native-dtype DMA; cast to f32 in the VPU (no-op for f32 inputs).
    p = pred_ref[...].astype(jnp.float32)
    t = tgt_ref[...].astype(jnp.float32)

    if binary_targets:
        # Hard {0,1} targets: a single log per element.
        x = jnp.where(t > 0.5, p, 1.0 - p)
        nloss = jnp.maximum(jnp.log(x), _LOG_CLAMP)
    else:
        # PyTorch-style clamped BCE, fused combine (fewer VALU ops):
        #   t*log(p) + (1-t)*log(1-p) == log1mp + t*(logp - log1mp)
        log_p = jnp.maximum(jnp.log(p), _LOG_CLAMP)
        log_1mp = jnp.maximum(jnp.log1p(-p), _LOG_CLAMP)
        nloss = log_1mp + t * (log_p - log_1mp)

    three_d = nloss.ndim == 3

    def _accumulate(x):
        if three_d:
            acc_ref[...] += jnp.sum(x, axis=1)                    # (tn, 128)
        else:
            acc_ref[...] += jnp.sum(x, axis=-1, keepdims=True)    # (tn, 1)

    ragged = (minor_size % minor_block) != 0          # partial tail block
    has_overflow = (n_splits * k_per_split) > k_total  # phantom step after clamp

    if (not ragged) and (not has_overflow):
        _accumulate(nloss)
    else:
        plain_cond = (g < k_total - 1) if ragged else (g < k_total)

        @pl.when(plain_cond)
        def _():
            _accumulate(nloss)

        if ragged:
            @pl.when(g == k_total - 1)
            def _():
                axis = 1 if three_d else nloss.ndim - 1
                idx = jax.lax.broadcasted_iota(jnp.int32, nloss.shape, axis)
                valid = (idx + g * minor_block) < minor_size
                # Mask AFTER the loss so garbage in the partial block cannot
                # inject NaN/Inf into the accumulator.
                _accumulate(jnp.where(valid, nloss, 0.0))

    # Final (narrow) store once per (batch block, split): scale by -1/L since
    # we accumulated the negative loss.
    @pl.when(k == k_per_split - 1)
    def _():
        if three_d:
            total = jnp.sum(acc_ref[...], axis=-1, keepdims=True)
        else:
            total = acc_ref[...]
        out_ref[...] = (total * neg_inv_len).astype(out_ref.dtype)


def binary_segm_bce(pred: jax.Array, target: jax.Array, reduction: str = "mean",
                    *, binary_targets: bool = False):
    if reduction not in ("none", "mean", "sum"):
        raise ValueError(
            f"reduction should be 'none', 'mean' or 'sum', get '{reduction}'")
    assert pred.shape == target.shape
    assert pred.shape[1] == 1, "channel dim must be 1"
    # TODO(synk): the PyTorch module asserts 0 <= pred <= 1 at runtime; we
    # assume valid probabilities here (no cheap in-kernel assert on TPU).

    n = pred.shape[0]
    l = 1
    for d in pred.shape[1:]:
        l *= d

    # Free row-major reshapes; native dtypes kept (half HBM traffic for bf16).
    pred2 = pred.reshape(n, l)
    tgt2 = target.reshape(n, l)

    itemsize = max(jnp.dtype(pred2.dtype).itemsize, jnp.dtype(tgt2.dtype).itemsize, 1)
    sub_q = max(8, 32 // itemsize)            # 8 f32, 16 bf16, 32 int8/fp8

    # Batch tile.  It is the second-to-last dim of the 2-D blocks and of the
    # output block, so it must be a multiple of 8 or equal n.
    tn = n if n <= sub_q else sub_q
    gi = _cdiv(n, tn)

    use_3d = (l % _LANE) == 0
    if use_3d:
        # Lane/sublane-dense view: full vreg occupancy even for tiny batches.
        minor_size = l // _LANE               # rows of 128 lanes
        mq = sub_q
        unit_bytes = tn * _LANE * itemsize
        pred_in = pred2.reshape(n, minor_size, _LANE)
        tgt_in = tgt2.reshape(n, minor_size, _LANE)
    else:
        # Ragged L: keep the raw (n, L) layout (no host-side pad -> no extra
        # HBM traffic); tail lane block masked in-kernel.
        minor_size = l
        mq = _LANE
        unit_bytes = tn * itemsize
        pred_in, tgt_in = pred2, tgt2

    budget = max(mq, (_TARGET_TILE_BYTES // unit_bytes) // mq * mq)
    # Single batch block: split the reduction axis so both v7x TensorCores get
    # a 'parallel' step (per-split partials summed in JAX).  Harmless on
    # single-TC chips.
    want_split = (gi == 1) and (minor_size > mq)
    if want_split:
        budget = min(budget, _round_up(_cdiv(minor_size, 2), mq))

    minor_block = minor_size if minor_size <= budget else budget
    k_total = _cdiv(minor_size, minor_block)
    n_splits = 2 if (gi == 1 and k_total >= 2) else 1
    k_per_split = _cdiv(k_total, n_splits)
    clamp = (n_splits * k_per_split) > k_total    # odd block count with 2 splits

    kps = k_per_split
    last_blk = k_total - 1

    if use_3d:
        block = (tn, minor_block, _LANE)
        if clamp:
            in_map = lambda i, s, k: (i, jnp.minimum(s * kps + k, last_blk), 0)
        else:
            in_map = lambda i, s, k: (i, s * kps + k, 0)
        acc_shape = (tn, _LANE)
    else:
        block = (tn, minor_block)
        if clamp:
            in_map = lambda i, s, k: (i, jnp.minimum(s * kps + k, last_blk))
        else:
            in_map = lambda i, s, k: (i, s * kps + k)
        acc_shape = (tn, 1)

    out_map = lambda i, s, k: (s, i, 0)

    kernel = functools.partial(
        _bce_kernel,
        neg_inv_len=-1.0 / float(l),
        minor_size=minor_size,
        minor_block=minor_block,
        k_per_split=k_per_split,
        k_total=k_total,
        n_splits=n_splits,
        binary_targets=binary_targets,
    )

    n_log = 1 if binary_targets else 2
    cost = pl.CostEstimate(
        flops=6 * n * l,
        transcendentals=n_log * n * l,
        bytes_accessed=n * l * (jnp.dtype(pred2.dtype).itemsize
                                + jnp.dtype(tgt2.dtype).itemsize)
        + 4 * n * n_splits,
    )

    partials = pl.pallas_call(
        kernel,
        out_shape=jax.ShapeDtypeStruct((n_splits, n, 1), jnp.float32),
        grid_spec=pltpu.PrefetchScalarGridSpec(
            num_scalar_prefetch=0,
            grid=(gi, n_splits, k_per_split),
            in_specs=[
                pl.BlockSpec(block, in_map),
                pl.BlockSpec(block, in_map),
            ],
            out_specs=pl.BlockSpec((None, tn, 1), out_map),
            scratch_shapes=[pltpu.VMEM(acc_shape, jnp.float32)],
        ),
        compiler_params=pltpu.CompilerParams(
            dimension_semantics=("parallel", "parallel", "arbitrary"),
            vmem_limit_bytes=32 * 1024 * 1024,
        ),
        cost_estimate=cost,
    )(pred_in, tgt_in)

    per_sample = jnp.sum(partials, axis=0)[:, 0]   # (n,) float32

    if reduction == "mean":
        return jnp.mean(per_sample)
    elif reduction == "sum":
        return jnp.sum(per_sample)
    else:  # 'none'
        return per_sample


def _reference(pred, target, reduction="mean"):
    n = pred.shape[0]
    p = pred.reshape(n, -1).astype(jnp.float32)
    t = target.reshape(n, -1).astype(jnp.float32)
    log_p = jnp.maximum(jnp.log(p), _LOG_CLAMP)
    log_1mp = jnp.maximum(jnp.log1p(-p), _LOG_CLAMP)
    bce = jnp.mean(-(t * log_p + (1.0 - t) * log_1mp), axis=-1)
    if reduction == "mean":
        return jnp.mean(bce)
    if reduction == "sum":
        return jnp.sum(bce)
    return bce


if __name__ == "__main__":
    key = jax.random.PRNGKey(0)
    keys = jax.random.split(key, 10)

    # 1) Aligned small case (2, 1, 16, 16): 3-D path, single reduction block.
    p1 = jax.nn.sigmoid(jax.random.normal(keys[0], (2, 1, 16, 16), jnp.float32))
    t1 = (jax.random.uniform(keys[1], (2, 1, 16, 16)) > 0.5).astype(jnp.float32)
    for red in ("mean", "sum", "none"):
        out = jax.block_until_ready(binary_segm_bce(p1, t1, red))
        assert jnp.allclose(out, _reference(p1, t1, red), rtol=1e-5, atol=1e-5), red

    # Optional 1-log fast path agrees for hard {0,1} targets.
    out_bt = jax.block_until_ready(binary_segm_bce(p1, t1, "none", binary_targets=True))
    assert jnp.allclose(out_bt, _reference(p1, t1, "none"), rtol=1e-5, atol=1e-5)

    # 2) Ragged L (= 255): 2-D fallback path, masked tail block, 2-way split.
    p2 = jax.nn.sigmoid(jax.random.normal(keys[2], (3, 1, 15, 17), jnp.float32))
    t2 = (jax.random.uniform(keys[3], (3, 1, 15, 17)) > 0.5).astype(jnp.float32)
    out2 = jax.block_until_ready(binary_segm_bce(p2, t2, "none"))
    assert jnp.allclose(out2, _reference(p2, t2, "none"), rtol=1e-5, atol=1e-5)

    # 3) bf16 inputs, aligned (4, 1, 64, 64): dtype-aware sublane quantum, split.
    p3 = jax.nn.sigmoid(
        jax.random.normal(keys[4], (4, 1, 64, 64), jnp.float32)).astype(jnp.bfloat16)
    t3 = (jax.random.uniform(keys[5], (4, 1, 64, 64)) > 0.5).astype(jnp.bfloat16)
    out3 = jax.block_until_ready(binary_segm_bce(p3, t3, "none"))
    assert jnp.allclose(out3, _reference(p3, t3, "none"), rtol=1e-5, atol=1e-5)

    # 4) n > 8 (partial batch block): (10, 1, 32, 32).
    p4 = jax.nn.sigmoid(jax.random.normal(keys[6], (10, 1, 32, 32), jnp.float32))
    t4 = (jax.random.uniform(keys[7], (10, 1, 32, 32)) > 0.5).astype(jnp.float32)
    out4 = jax.block_until_ready(binary_segm_bce(p4, t4, "mean"))
    assert jnp.allclose(out4, _reference(p4, t4, "mean"), rtol=1e-5, atol=1e-5)

    # 5) Large aligned case with an odd number of reduction blocks: exercises
    #    the 2-way split with a clamped phantom block + ragged tail mask.
    p5 = jax.nn.sigmoid(jax.random.normal(keys[8], (2, 1, 1_200_000), jnp.float32))
    t5 = (jax.random.uniform(keys[9], (2, 1, 1_200_000)) > 0.5).astype(jnp.float32)
    out5 = jax.block_until_ready(binary_segm_bce(p5, t5, "none"))
    assert jnp.allclose(out5, _reference(p5, t5, "none"), rtol=1e-4, atol=1e-5)

    print("KERNEL_OK")
</pallas_src>

<mosaic_0001>
module attributes {stable_mosaic.version = 11 : i64} {
  func.func @_bce_kernel(%arg0: i32, %arg1: i32, %arg2: i32, %arg3: memref<2x2x128xf32, #tpu.memory_space<vmem>>, %arg4: memref<2x2x128xf32, #tpu.memory_space<vmem>>, %arg5: memref<1x2x1xf32, #tpu.memory_space<vmem>>, %arg6: memref<2x128xf32, #tpu.memory_space<vmem>>) attributes {dimension_semantics = [#tpu.dimension_semantics<parallel>, #tpu.dimension_semantics<parallel>, #tpu.dimension_semantics<arbitrary>], iteration_bounds = array<i64: 1, 1, 1>, scalar_prefetch = 0 : i64, scratch_operands = 1 : i64, tpu.core_type = #tpu.core_type<tc>, window_params = [{transform_indices = @transform_0, window_bounds = array<i64: 2, 2, 128>}, {transform_indices = @transform_1, window_bounds = array<i64: 2, 2, 128>}, {transform_indices = @transform_2, window_bounds = array<i64: 1, 2, 1>}]} {
    %c0_i32 = arith.constant 0 : i32
    %0 = arith.cmpi eq, %arg2, %c0_i32 : i32
    %1 = arith.extui %0 : i1 to i32
    %c0_i32_0 = arith.constant 0 : i32
    %2 = arith.cmpi ne, %1, %c0_i32_0 : i32
    scf.if %2 {
      %cst_15 = arith.constant 0.000000e+00 : f32
      %23 = vector.broadcast %cst_15 : f32 to vector<2x128xf32>
      %c0_16 = arith.constant 0 : index
      %c0_17 = arith.constant 0 : index
      %24 = vector.load %arg6[%c0_16, %c0_17] : memref<2x128xf32, #tpu.memory_space<vmem>>, vector<2x128xf32>
      tpu.vector_store %arg6[%c0_16, %c0_17], %23 {strides = array<i32>} : memref<2x128xf32, #tpu.memory_space<vmem>>, vector<2x128xf32>,
    } else {
    }
    %c0 = arith.constant 0 : index
    %c0_1 = arith.constant 0 : index
    %c0_2 = arith.constant 0 : index
    %3 = vector.load %arg3[%c0, %c0_1, %c0_2] : memref<2x2x128xf32, #tpu.memory_space<vmem>>, vector<2x2x128xf32>
    %c0_3 = arith.constant 0 : index
    %c0_4 = arith.constant 0 : index
    %c0_5 = arith.constant 0 : index
    %4 = vector.load %arg4[%c0_3, %c0_4, %c0_5] : memref<2x2x128xf32, #tpu.memory_space<vmem>>, vector<2x2x128xf32>
    %5 = math.log %3 : vector<2x2x128xf32>
    %cst = arith.constant -1.000000e+02 : f32
    %6 = vector.broadcast %cst : f32 to vector<2x2x128xf32>
    %7 = arith.maximumf %5, %6 : vector<2x2x128xf32>
    %cst_6 = arith.constant 0.000000e+00 : f32
    %8 = vector.broadcast %cst_6 : f32 to vector<2x2x128xf32>
    %9 = arith.subf %8, %3 : vector<2x2x128xf32>
    %10 = math.log1p %9 : vector<2x2x128xf32>
    %cst_7 = arith.constant -1.000000e+02 : f32
    %11 = vector.broadcast %cst_7 : f32 to vector<2x2x128xf32>
    %12 = arith.maximumf %10, %11 : vector<2x2x128xf32>
    %13 = arith.subf %7, %12 : vector<2x2x128xf32>
    %14 = arith.mulf %4, %13 : vector<2x2x128xf32>
    %15 = arith.addf %12, %14 : vector<2x2x128xf32>
    %c0_8 = arith.constant 0 : index
    %c0_9 = arith.constant 0 : index
    %16 = vector.load %arg6[%c0_8, %c0_9] : memref<2x128xf32, #tpu.memory_space<vmem>>, vector<2x128xf32>
    %cst_10 = arith.constant dense<0.000000e+00> : vector<2x128xf32>
    %17 = vector.multi_reduction <add>, %15, %cst_10 [1] : vector<2x2x128xf32> to vector<2x128xf32>
    %18 = arith.addf %16, %17 : vector<2x128xf32>
    %c0_11 = arith.constant 0 : index
    %c0_12 = arith.constant 0 : index
    %19 = vector.load %arg6[%c0_11, %c0_12] : memref<2x128xf32, #tpu.memory_space<vmem>>, vector<2x128xf32>
    tpu.vector_store %arg6[%c0_11, %c0_12], %18 {strides = array<i32>} : memref<2x128xf32, #tpu.memory_space<vmem>>, vector<2x128xf32>,
    %c0_i32_13 = arith.constant 0 : i32
    %20 = arith.cmpi eq, %arg2, %c0_i32_13 : i32
    %21 = arith.extui %20 : i1 to i32
    %c0_i32_14 = arith.constant 0 : i32
    %22 = arith.cmpi ne, %21, %c0_i32_14 : i32
    scf.if %22 {
      %c0_15 = arith.constant 0 : index
      %c0_16 = arith.constant 0 : index
      %23 = vector.load %arg6[%c0_15, %c0_16] : memref<2x128xf32, #tpu.memory_space<vmem>>, vector<2x128xf32>
      %cst_17 = arith.constant dense<0.000000e+00> : vector<2xf32>
      %24 = vector.multi_reduction <add>, %23, %cst_17 [1] : vector<2x128xf32> to vector<2xf32>
      %25 = vector.shape_cast %24 : vector<2xf32> to vector<2x1xf32>
      %cst_18 = arith.constant -3.906250e-03 : f32
      %26 = vector.broadcast %cst_18 : f32 to vector<2x1xf32>
      %27 = arith.mulf %25, %26 : vector<2x1xf32>
      %c0_19 = arith.constant 0 : index
      %c0_20 = arith.constant 0 : index
      %c0_21 = arith.constant 0 : index
      %28 = vector.load %arg5[%c0_19, %c0_20, %c0_21] : memref<1x2x1xf32, #tpu.memory_space<vmem>>, vector<1x2x1xf32>
      %29 = vector.shape_cast %28 : vector<1x2x1xf32> to vector<2x1xf32>
      %30 = vector.shape_cast %27 : vector<2x1xf32> to vector<1x2x1xf32>
      tpu.vector_store %arg5[%c0_19, %c0_20, %c0_21], %30 {strides = array<i32>} : memref<1x2x1xf32, #tpu.memory_space<vmem>>, vector<1x2x1xf32>,
    } else {
    }
    return
  }
  func.func @transform_0(%arg0: i32, %arg1: i32, %arg2: i32) -> (i32, i32, i32) {
    %c1_i32 = arith.constant 1 : i32
    %0 = arith.muli %arg1, %c1_i32 : i32
    %1 = arith.addi %0, %arg2 : i32
    %c0_i32 = arith.constant 0 : i32
    %c0_i32_0 = arith.constant 0 : i32
    return %arg0, %1, %c0_i32 : i32, i32, i32
  }
  func.func @transform_1(%arg0: i32, %arg1: i32, %arg2: i32) -> (i32, i32, i32) {
    %c1_i32 = arith.constant 1 : i32
    %0 = arith.muli %arg1, %c1_i32 : i32
    %1 = arith.addi %0, %arg2 : i32
    %c0_i32 = arith.constant 0 : i32
    %c0_i32_0 = arith.constant 0 : i32
    return %arg0, %1, %c0_i32 : i32, i32, i32
  }
  func.func @transform_2(%arg0: i32, %arg1: i32, %arg2: i32) -> (i32, i32, i32) {
    %c0_i32 = arith.constant 0 : i32
    %c0_i32_0 = arith.constant 0 : i32
    return %arg1, %arg0, %c0_i32 : i32, i32, i32
  }
}

</mosaic_0001>

<bundles_post_ra>
// kernel: tpu_custom_call.1
= control target key start
LH: loop header
LB: loop body
LE: loop exit
PB: predicated region body
PF: predicated region fallthrough
CT: control target
= control target key end

     0   :  { %7 = vsyncpa [#allocation4], 0  ;;  %s240_s0 = inlined_call_operand.hbm [shape: f32[2,2,128], index: 0, kind: input, shape index: {}]   ;;  %s241_s1 = inlined_call_operand.hbm [shape: f32[2,2,128], index: 1, kind: input, shape index: {}]   ;;  %s242_s2 = inlined_call_operand.vmem [shape: f32[1,2,1], index: 2, kind: output, shape index: {}]  }
   0x1   :  { %8 = vsyncpa [#allocation6], 0  ;;  %s190_s9 = smov [#allocation3]   ;;  %s142_s13 = scalar_lea.hbm %s240_s0, 64 }
   0x2   :  { %s17_s10 = sshll.u32 %s190_s9, 4  ;;  %p143_p0 = scmp.ne.s32.totalorder %s240_s0, %s142_s13  ;;  %s18_s10 = int_to_ptr.vmem [resolvable:$true] %s17_s10 }
   0x3   :  { %p146_p1 = scmp.lt.u32.totalorder %s142_s13, %s240_s0 }
   0x5   :  { %p148_p2 = pnand %p146_p1, %p143_p0 }
   0x7   :  { %151 = shalt.err (!%p148_p2)
}
   0x8   :  { %s152_s18 = scalar_lea.vmem %s18_s10, 64  ;;  %p157_p4 = scmp.lt.s32.totalorder %s18_s10, %s18_s10 }
   0x9   :  { %p153_p3 = scmp.ne.s32.totalorder %s18_s10, %s152_s18  ;;  %p158_p5 = scmp.lt.s32.totalorder %s152_s18, %s152_s18 }
   0xb   :  { %p159_p6 = por %p158_p5, %p157_p4 }
   0xd   :  { %p160_p7 = pnand %p159_p6, %p153_p3 }
   0xf   :  { %163 = shalt.err (!%p160_p7)
}
  0x10   :  { %s191_s19 = smov 32   ;;  %s192_s20 = smov 2  }
  0x11   :  { %23 = dma.hbm_to_vmem [thread:$0]  %s240_s0, 64, %s18_s10, [#allocation4], %s191_s19, %s191_s19, %s192_s20  }
  0x12   :  { %s193_s23 = smov [#allocation5]   ;;  %s164_s27 = scalar_lea.hbm %s241_s1, 64 }
  0x13   :  { %s32_s24 = sshll.u32 %s193_s23, 4  ;;  %p165_p8 = scmp.ne.s32.totalorder %s241_s1, %s164_s27  ;;  %s33_s24 = int_to_ptr.vmem [resolvable:$true] %s32_s24 }
  0x14   :  { %p168_p9 = scmp.lt.u32.totalorder %s164_s27, %s241_s1 }
  0x16   :  { %p170_p10 = pnand %p168_p9, %p165_p8 }
  0x18   :  { %173 = shalt.err (!%p170_p10)
}
  0x19   :  { %s174_s4 = scalar_lea.vmem %s33_s24, 64  ;;  %p179_p12 = scmp.lt.s32.totalorder %s33_s24, %s33_s24 }
  0x1a   :  { %p175_p11 = scmp.ne.s32.totalorder %s33_s24, %s174_s4  ;;  %p180_p13 = scmp.lt.s32.totalorder %s174_s4, %s174_s4 }
  0x1c   :  { %p181_p0 = por %p180_p13, %p179_p12 }
  0x1e   :  { %p182_p1 = pnand %p181_p0, %p175_p11 }
  0x20   :  { %185 = shalt.err (!%p182_p1)
}
  0x21   :  { %38 = dma.hbm_to_vmem [thread:$0]  %s241_s1, 64, %s33_s24, [#allocation6], %s191_s19, %s191_s19, %s192_s20  }
  0x22   :  { %186 = dma.done.wait [#allocation4], 64  }
  0x23   :  { %187 = vsyncadd [#allocation4], 4294967232 }
  0x24   :  { %188 = dma.done.wait [#allocation6], 64  }
  0x25   :  { %189 = vsyncadd [#allocation6], 4294967232  ;;  %v194_v0 = vmov 0.0   ;;  %v52_v1 = vld [vmem:[#allocation3] sm:$0x3]  ;;  %vm91_vm2 = vcmask 1041408  }
  0x26   :  { %51 = vst [vmem:[#allocation2] sm:$0x3] %v194_v0  ;;  %v53_v2 = vld [vmem:[#allocation3 + $0x2] sm:$0x3]  ;;  %134 = vlog2.f32 %v52_v1  ;;  %v62_v3 = vsub.f32 0.0, %v52_v1  ;;  %vm108_vm3 = vcmask 1041409  }
  0x27   :  { %v63_v4 = vsub.f32 0.0, %v53_v2  ;;  %136 = vlog2.f32 %v53_v2  ;;  %v54_v28 = vld [vmem:[#allocation5] sm:$0x3]  ;;  %v55_v30 = vld [vmem:[#allocation5 + $0x2] sm:$0x3]  ;;  %vm121_vm4 = vcmask 1024  }
  0x28   :  { %v64_v5 = vadd.f32 1.0, %v62_v3  ;;  %v67_v7 = vmul.f32 -0.5, %v62_v3  ;;  %v70_v11 = vand.u32 2147483647, %v62_v3 }
  0x29   :  { %v73_v6 = vadd.f32 1.0, %v63_v4  ;;  %v76_v8 = vmul.f32 -0.5, %v63_v4  ;;  %v79_v14 = vand.u32 2147483647, %v63_v4 }
  0x2a   :  { %138 = vlog2.f32 %v64_v5  ;;  %v68_v9 = vadd.f32 1.0, %v67_v7  ;;  %vm71_vm0 = vcmp.lt.f32.partialorder %v70_v11, 0.0004427343 }
  0x2b   :  { %140 = vlog2.f32 %v73_v6  ;;  %v77_v12 = vadd.f32 1.0, %v76_v8  ;;  %vm80_vm1 = vcmp.lt.f32.partialorder %v79_v14, 0.0004427343 }
  0x2c   :  { %v69_v17 = vmul.f32 %v68_v9, %v62_v3 }
  0x2d   :  { %v78_v19 = vmul.f32 %v77_v12, %v63_v4  ;;  %v90_v50 = vld [vmem:[#allocation2] sm:$0x3] }
  0x30   :  { %v135_v10 = vpop.eup %134 }
  0x31   :  { %v137_v13 = vpop.eup %136  ;;  %v57_v15 = vmul.f32 0.6931472, %v135_v10 }
  0x32   :  { %v59_v16 = vmul.f32 0.6931472, %v137_v13 }
  0x33   :  { %v60_v22 = vmax.f32 %v57_v15, -100.0 }
  0x34   :  { %v139_v18 = vpop.eup %138  ;;  %v61_v24 = vmax.f32 %v59_v16, -100.0 }
  0x35   :  { %v141_v20 = vpop.eup %140  ;;  %v66_v21 = vmul.f32 0.6931472, %v139_v18 }
  0x36   :  { %v75_v23 = vmul.f32 0.6931472, %v141_v20 }
  0x37   :  { %v72_v25 = vsel %vm71_vm0, %v69_v17, %v66_v21 }
  0x38   :  { %v81_v26 = vsel %vm80_vm1, %v78_v19, %v75_v23  ;;  %v82_v27 = vmax.f32 %v72_v25, -100.0 }
  0x39   :  { %v83_v29 = vmax.f32 %v81_v26, -100.0 }
  0x3a   :  { %v84_v31 = vsub.f32 %v60_v22, %v82_v27 }
  0x3b   :  { %v85_v32 = vsub.f32 %v61_v24, %v83_v29 }
  0x3c   :  { %v86_v33 = vmul.f32 %v84_v31, %v54_v28 }
  0x3d   :  { %v87_v34 = vmul.f32 %v85_v32, %v55_v30 }
  0x3e   :  { %v88_v35 = vadd.f32 %v86_v33, %v82_v27 }
  0x3f   :  { %v89_v36 = vadd.f32 %v87_v34, %v83_v29 }
  0x40   :  { %v92_v37 = vsel %vm91_vm2, %v88_v35, 0.0 }
  0x41   :  { %v93_v38 = vrot.slane %v92_v37, 4  ;;  %v99_v39 = vsel %vm91_vm2, %v89_v36, 0.0 }
  0x42   :  { %v100_v40 = vrot.slane %v99_v39, 4 }
  0x43   :  { %v94_v41 = vadd.f32 %v93_v38, %v92_v37 }
  0x44   :  { %v101_v42 = vadd.f32 %v100_v40, %v99_v39 }
  0x45   :  { %v95_v43 = vrot.slane %v94_v41, 2 }
  0x46   :  { %v102_v44 = vrot.slane %v101_v42, 2 }
  0x47   :  { %v96_v45 = vadd.f32 %v95_v43, %v94_v41 }
  0x48   :  { %v103_v46 = vadd.f32 %v102_v44, %v101_v42 }
  0x49   :  { %v97_v47 = vrot.slane %v96_v45, 1 }
  0x4a   :  { %v104_v48 = vrot.slane %v103_v46, 1 }
  0x4b   :  { %v98_v49 = vadd.f32 %v97_v47, %v96_v45 }
  0x4c   :  { %v105_v51 = vadd.f32 %v104_v48, %v103_v46 }
  0x4e   :  { %v109_v52 = vsel %vm108_vm3, %v105_v51, %v98_v49 }
  0x4f   :  { %v111_v53 = vadd.f32 %v109_v52, %v90_v50 }
  0x51   :  { %112 = vst [vmem:[#allocation2] sm:$0x3] %v111_v53 }
  0x58   :  { %v116_v54 = vld [vmem:[#allocation2] sm:$0x3] }
  0x59   :  { %v117_v55 = vsel %vm91_vm2, %v116_v54, 0.0 }
  0x5a   :  { %118 = vadd.xlane.f32.xlu0 %v117_v55 }
  0xe7   :  { %v119_v56 = vpop.xlane.xlu0 %118 }
  0xe8   :  { %v120_v57 = vmul.f32 -0.00390625, %v119_v56 }
  0xea   :  { %122 = vst.msk [vmem:[%s242_s2] sm:$0x3] %vm121_vm4, %v120_v57 }
  0xeb   :  { %127 = vsyncpa [#allocation4], 1 }
  0xec   :  { %128 = vsyncpa [#allocation6], 1 }

</bundles_post_ra>
